<compile_context>
chip_gen: v5e
topology: v5e:2x2
jax: 0.10.0
libtpu: 0.0.40
codegen_flags: <defaults>
</compile_context>

<pallas_src>
import functools

import jax
import jax.numpy as jnp
from jax.experimental import pallas as pl
from jax.experimental.pallas import tpu as pltpu


# --------------------------- hardware introspection -------------------------- #

@functools.lru_cache(maxsize=1)
def _tpu_vmem_bytes() -> int:
    """Physical per-core VMEM bytes; conservative (v7x, 64 MiB) fallback."""
    try:
        return int(pltpu.get_tpu_info().vmem_capacity_bytes)
    except Exception:
        return 64 << 20


@functools.lru_cache(maxsize=1)
def _tpu_num_tensorcores() -> int:
    """Best-effort TensorCores per chip (2 on v7x). Falls back to 1 (safe)."""
    try:
        info = pltpu.get_tpu_info()
        for name in ("num_cores", "core_count", "num_tensorcores", "tensorcore_count"):
            v = getattr(info, name, None)
            if isinstance(v, int) and v >= 1:
                return v
    except Exception:
        pass
    return 1


# ----------------------------- kernels --------------------------------------- #

def _mse_kernel(f1_ref, f2_ref, o_ref, acc_ref, *, n_rows, tiles_per_split,
                mask_needed):
    """Per split: accumulate sum((x-y)^2) into a (1, D) accumulator; write the
    per-split scalar partial sum on the last reduction step."""
    p = pl.program_id(0)
    r = pl.program_id(1)
    tile_n = f1_ref.shape[0]
    logical_tile = p * tiles_per_split + r

    @pl.when(r == 0)
    def _():
        acc_ref[...] = jnp.zeros_like(acc_ref)

    x = f1_ref[...].astype(jnp.float32)
    y = f2_ref[...].astype(jnp.float32)
    diff = x - y
    sq = diff * diff

    if mask_needed:  # static: some logical tiles are partial or fully padded
        n_full_tiles = n_rows // tile_n

        @pl.when(logical_tile < n_full_tiles)
        def _():
            acc_ref[...] += jnp.sum(sq, axis=0, keepdims=True)

        @pl.when(logical_tile >= n_full_tiles)
        def _():
            row = (jax.lax.broadcasted_iota(jnp.int32, (tile_n, 1), 0)
                   + logical_tile * tile_n)
            acc_ref[...] += jnp.sum(jnp.where(row < n_rows, sq, 0.0),
                                    axis=0, keepdims=True)
    else:
        acc_ref[...] += jnp.sum(sq, axis=0, keepdims=True)

    @pl.when(r == pl.num_programs(1) - 1)
    def _():
        # Single cross-lane (XLU) reduce per split, outside the steady-state loop.
        o_ref[0] = jnp.sum(acc_ref[...], axis=-1, keepdims=True)  # (1, 1)


def _cosine_kernel(f1_ref, f2_ref, o_ref, acc_ref, *, n_rows, tiles_per_split,
                   mask_needed):
    """Per split: accumulate sum(cos_sim(x, y, dim=-1)) with PyTorch eps semantics."""
    p = pl.program_id(0)
    r = pl.program_id(1)
    tile_n = f1_ref.shape[0]
    logical_tile = p * tiles_per_split + r

    @pl.when(r == 0)
    def _():
        acc_ref[...] = jnp.zeros_like(acc_ref)

    x = f1_ref[...].astype(jnp.float32)
    y = f2_ref[...].astype(jnp.float32)
    dot = jnp.sum(x * y, axis=-1, keepdims=True)           # (tile_n, 1)
    nx = jnp.sqrt(jnp.sum(x * x, axis=-1, keepdims=True))
    ny = jnp.sqrt(jnp.sum(y * y, axis=-1, keepdims=True))
    # F.cosine_similarity clamps each norm separately at eps=1e-8.
    denom = jnp.maximum(nx, jnp.float32(1e-8)) * jnp.maximum(ny, jnp.float32(1e-8))
    cos = dot / denom

    if mask_needed:
        n_full_tiles = n_rows // tile_n

        @pl.when(logical_tile < n_full_tiles)
        def _():
            acc_ref[...] += jnp.sum(cos, axis=0, keepdims=True)

        @pl.when(logical_tile >= n_full_tiles)
        def _():
            row = (jax.lax.broadcasted_iota(jnp.int32, (tile_n, 1), 0)
                   + logical_tile * tile_n)
            acc_ref[...] += jnp.sum(jnp.where(row < n_rows, cos, 0.0),
                                    axis=0, keepdims=True)
    else:
        acc_ref[...] += jnp.sum(cos, axis=0, keepdims=True)

    @pl.when(r == pl.num_programs(1) - 1)
    def _():
        o_ref[0] = acc_ref[...]                              # (1, 1)


# ----------------------------- wrapper ---------------------------------------- #

def _run_reduction_kernel(kernel_fn, f1, f2, *, acc_cols, tile_n=None,
                          num_splits=None, flops_per_elem=3, transcendentals=0):
    """Row-tiled streaming reduction; returns the grand partial sum (f32 scalar)."""
    n, d = f1.shape
    itemsize = f1.dtype.itemsize

    phys_vmem = _tpu_vmem_bytes()
    vmem_cap = int(phys_vmem * 3 // 4)            # never request more than exists

    # Sub-32-bit dtypes pack rows along sublanes: f32 -> 8, bf16 -> 16, int8 -> 32.
    granule = 8 * max(1, 4 // max(1, itemsize))

    # Bigger blocks = fewer per-step overheads (~0.35us each) and bigger DMAs.
    # 2 inputs x 2 pipeline buffers x block must stay inside the per-core VMEM cap.
    max_block_bytes = max((vmem_cap - (8 << 20)) // 4, 1 << 20)
    if tile_n is None:
        target_block_bytes = min(8 << 20, max_block_bytes)
        tile_n = max(granule, target_block_bytes // max(1, d * itemsize))
    tile_n = min(tile_n, max(granule, max_block_bytes // max(1, d * itemsize)))
    if tile_n >= n:
        tile_n = n                                 # single full-extent block (any N)
    else:
        tile_n = max(granule, (tile_n // granule) * granule)

    total_tiles = pl.cdiv(n, tile_n)

    # Split the row tiles across TensorCores (v7x has 2); serial + harmless elsewhere.
    if num_splits is None:
        num_splits = _tpu_num_tensorcores() if total_tiles >= 8 else 1
    num_splits = int(max(1, min(num_splits, total_tiles, 4)))
    tiles_per_split = pl.cdiv(total_tiles, num_splits)
    max_block_idx = total_tiles - 1
    # True iff any logical tile is partial or fully past the end of the array.
    mask_needed = (num_splits * tiles_per_split * tile_n) != n

    def in_map(p, r):
        # Clamp padded logical tiles onto the last real block (their rows get masked).
        return (jnp.minimum(p * tiles_per_split + r, max_block_idx), 0)

    block_bytes = tile_n * d * itemsize
    vmem_limit = int(min(max(4 * block_bytes + (8 << 20), 16 << 20), vmem_cap))

    partials = pl.pallas_call(
        functools.partial(kernel_fn, n_rows=n, tiles_per_split=tiles_per_split,
                          mask_needed=mask_needed),
        out_shape=jax.ShapeDtypeStruct((num_splits, 1, 1), jnp.float32),
        grid_spec=pltpu.PrefetchScalarGridSpec(
            num_scalar_prefetch=0,
            grid=(num_splits, tiles_per_split),
            in_specs=[
                pl.BlockSpec((tile_n, d), in_map),
                pl.BlockSpec((tile_n, d), in_map),
            ],
            out_specs=pl.BlockSpec((1, 1, 1), lambda p, r: (p, 0, 0)),
            scratch_shapes=[pltpu.VMEM((1, acc_cols), jnp.float32)],
        ),
        compiler_params=pltpu.CompilerParams(
            dimension_semantics=("parallel", "arbitrary"),
            vmem_limit_bytes=vmem_limit,
        ),
        cost_estimate=pl.CostEstimate(
            flops=flops_per_elem * n * d,
            transcendentals=transcendentals,
            bytes_accessed=2 * n * d * itemsize + 4 * num_splits,
        ),
    )(f1, f2)
    return jnp.sum(partials)


# ----------------------------- reference (pure JAX) --------------------------- #

def _ref_mse(x, y):
    return jnp.mean((x.astype(jnp.float32) - y.astype(jnp.float32)) ** 2)


def _ref_cosine(x, y):
    x = x.astype(jnp.float32)
    y = y.astype(jnp.float32)
    dot = jnp.sum(x * y, axis=-1)
    nx = jnp.maximum(jnp.linalg.norm(x, axis=-1), 1e-8)
    ny = jnp.maximum(jnp.linalg.norm(y, axis=-1), 1e-8)
    return 1.0 - jnp.mean(dot / (nx * ny))


# ----------------------------- module ----------------------------------------- #

# Below this element count the fixed pallas_call/DMA setup cost dominates; a fused
# XLA elementwise + reduce is as fast or faster.
_SMALL_INPUT_ELEMS = 16384


class FeatureConsistencyLoss:
    """JAX/Pallas port of the PyTorch FeatureConsistencyLoss module."""

    def __init__(self, loss_type: str = "mse", tile_n: int | None = None,
                 num_splits: int | None = None):
        if loss_type == "mse":
            self._kernel = _mse_kernel
            self._ref = _ref_mse
            self._flops_per_elem = 3
        elif loss_type == "cosine":
            self._kernel = _cosine_kernel
            self._ref = _ref_cosine
            self._flops_per_elem = 7
        else:
            raise ValueError(
                f"Unsupported loss_type for FeatureConsistencyLoss: {loss_type}"
            )
        self.loss_type = loss_type
        self.tile_n = tile_n
        self.num_splits = num_splits

    def __call__(self, features1: jnp.ndarray, features2: jnp.ndarray) -> jnp.ndarray:
        # Empty-tensor / shape-mismatch guards (mirror the PyTorch module).
        # TODO(synk): logger.debug / logger.warning calls are intentionally omitted.
        if features1.size == 0 or features2.size == 0:
            return jnp.array(0.0, dtype=jnp.float32)
        if features1.shape != features2.shape:
            return jnp.array(0.0, dtype=jnp.float32)

        # Flatten leading dims: cosine is over dim=-1, MSE over all elements,
        # so (..., D) -> (N, D) is semantics-preserving.
        f1 = features1.reshape(-1, features1.shape[-1])
        f2 = features2.reshape(-1, features2.shape[-1])
        n, d = f1.shape

        # Tiny-input fast path: let XLA fuse it instead of paying kernel launch cost.
        if f1.size < _SMALL_INPUT_ELEMS:
            return self._ref(f1, f2).astype(jnp.float32)

        if self.loss_type == "mse":
            total = _run_reduction_kernel(
                self._kernel, f1, f2, acc_cols=d,
                tile_n=self.tile_n, num_splits=self.num_splits,
                flops_per_elem=self._flops_per_elem, transcendentals=0)
            return total / jnp.float32(n * d)
        else:
            total = _run_reduction_kernel(
                self._kernel, f1, f2, acc_cols=1,
                tile_n=self.tile_n, num_splits=self.num_splits,
                flops_per_elem=self._flops_per_elem, transcendentals=2 * n)
            return jnp.float32(1.0) - total / jnp.float32(n)


# ----------------------------- main -------------------------------------------- #

if __name__ == "__main__":
    key = jax.random.PRNGKey(0)
    k1, k2, k3, k4 = jax.random.split(key, 4)

    # N=300, D=128 with tile_n=128, num_splits=2 exercises the 2-D grid (parallel
    # split axis), a clamped/fully-masked padded tile, and the masked partial tile
    # (rows 256..299). The auto path gives a single full-extent block.
    N, D = 300, 128
    f1 = jax.random.normal(k1, (N, D), dtype=jnp.float32)
    f2 = jax.random.normal(k2, (N, D), dtype=jnp.float32)

    mse_ref = _ref_mse(f1, f2)
    cos_ref = _ref_cosine(f1, f2)

    # MSE, explicit small tile + explicit 2-way split (multi-tile + masking path).
    mse_tiled = FeatureConsistencyLoss("mse", tile_n=128, num_splits=2)
    out = jax.block_until_ready(mse_tiled(f1, f2))
    assert jnp.allclose(out, mse_ref, rtol=1e-5, atol=1e-5), ("mse tiled", out, mse_ref)

    # MSE, auto tile / auto split.
    mse_auto = FeatureConsistencyLoss("mse")
    out = jax.block_until_ready(mse_auto(f1, f2))
    assert jnp.allclose(out, mse_ref, rtol=1e-5, atol=1e-5), ("mse auto", out, mse_ref)

    # Cosine, explicit small tile + 2-way split.
    cos_tiled = FeatureConsistencyLoss("cosine", tile_n=128, num_splits=2)
    out = jax.block_until_ready(cos_tiled(f1, f2))
    assert jnp.allclose(out, cos_ref, rtol=1e-5, atol=1e-5), ("cos tiled", out, cos_ref)

    # Cosine, auto tile / auto split.
    cos_auto = FeatureConsistencyLoss("cosine")
    out = jax.block_until_ready(cos_auto(f1, f2))
    assert jnp.allclose(out, cos_ref, rtol=1e-5, atol=1e-5), ("cos auto", out, cos_ref)

    # bf16 inputs: upcast happens inside the kernel (halves HBM traffic);
    # tile_n=128 is already a multiple of the bf16 16-row packing granule.
    f1b = f1.astype(jnp.bfloat16)
    f2b = f2.astype(jnp.bfloat16)
    out = jax.block_until_ready(mse_tiled(f1b, f2b))
    ref_b = _ref_mse(f1b, f2b)
    assert jnp.allclose(out, ref_b, rtol=1e-5, atol=1e-5), ("mse bf16", out, ref_b)

    # Small-input fast path and guard paths (mirror the PyTorch module).
    small1 = jax.random.normal(k3, (8, 128), dtype=jnp.float32)
    small2 = jax.random.normal(k4, (8, 128), dtype=jnp.float32)
    out = jax.block_until_ready(mse_auto(small1, small2))
    assert jnp.allclose(out, _ref_mse(small1, small2), rtol=1e-5, atol=1e-5)

    empty = jnp.zeros((0, D), dtype=jnp.float32)
    assert float(mse_auto(empty, empty)) == 0.0
    assert float(mse_auto(f1, f2[:, : D // 2])) == 0.0

    print("KERNEL_OK")
</pallas_src>

<mosaic_0001>
module attributes {stable_mosaic.version = 11 : i64} {
  func.func @_mse_kernel(%arg0: i32, %arg1: i32, %arg2: memref<128x128xf32, #tpu.memory_space<vmem>>, %arg3: memref<128x128xf32, #tpu.memory_space<vmem>>, %arg4: memref<1x1x1xf32, #tpu.memory_space<vmem>>, %arg5: memref<1x128xf32, #tpu.memory_space<vmem>>) attributes {dimension_semantics = [#tpu.dimension_semantics<parallel>, #tpu.dimension_semantics<arbitrary>], iteration_bounds = array<i64: 2, 2>, scalar_prefetch = 0 : i64, scratch_operands = 1 : i64, tpu.core_type = #tpu.core_type<tc>, window_params = [{transform_indices = @transform_0, window_bounds = array<i64: 128, 128>}, {transform_indices = @transform_1, window_bounds = array<i64: 128, 128>}, {transform_indices = @transform_2, window_bounds = array<i64: 1, 1, 1>}]} {
    %c2_i32 = arith.constant 2 : i32
    %0 = arith.muli %arg0, %c2_i32 : i32
    %1 = arith.addi %0, %arg1 : i32
    %c0_i32 = arith.constant 0 : i32
    %2 = arith.cmpi eq, %arg1, %c0_i32 : i32
    %3 = arith.extui %2 : i1 to i32
    %c0_i32_0 = arith.constant 0 : i32
    %4 = arith.cmpi ne, %3, %c0_i32_0 : i32
    scf.if %4 {
      %cst = arith.constant 0.000000e+00 : f32
      %18 = vector.broadcast %cst : f32 to vector<1x128xf32>
      %c0_9 = arith.constant 0 : index
      %c0_10 = arith.constant 0 : index
      %19 = vector.load %arg5[%c0_9, %c0_10] : memref<1x128xf32, #tpu.memory_space<vmem>>, vector<1x128xf32>
      tpu.vector_store %arg5[%c0_9, %c0_10], %18 {strides = array<i32>} : memref<1x128xf32, #tpu.memory_space<vmem>>, vector<1x128xf32>,
    } else {
    }
    %c0 = arith.constant 0 : index
    %c0_1 = arith.constant 0 : index
    %5 = vector.load %arg2[%c0, %c0_1] : memref<128x128xf32, #tpu.memory_space<vmem>>, vector<128x128xf32>
    %c0_2 = arith.constant 0 : index
    %c0_3 = arith.constant 0 : index
    %6 = vector.load %arg3[%c0_2, %c0_3] : memref<128x128xf32, #tpu.memory_space<vmem>>, vector<128x128xf32>
    %7 = arith.subf %5, %6 : vector<128x128xf32>
    %8 = arith.mulf %7, %7 : vector<128x128xf32>
    %c2_i32_4 = arith.constant 2 : i32
    %9 = arith.cmpi slt, %1, %c2_i32_4 : i32
    %10 = arith.extui %9 : i1 to i32
    %c0_i32_5 = arith.constant 0 : i32
    %11 = arith.cmpi ne, %10, %c0_i32_5 : i32
    scf.if %11 {
      %c0_9 = arith.constant 0 : index
      %c0_10 = arith.constant 0 : index
      %18 = vector.load %arg5[%c0_9, %c0_10] : memref<1x128xf32, #tpu.memory_space<vmem>>, vector<1x128xf32>
      %cst = arith.constant dense<0.000000e+00> : vector<128xf32>
      %19 = vector.multi_reduction <add>, %8, %cst [0] : vector<128x128xf32> to vector<128xf32>
      %20 = vector.shape_cast %19 : vector<128xf32> to vector<1x128xf32>
      %21 = arith.addf %18, %20 : vector<1x128xf32>
      %c0_11 = arith.constant 0 : index
      %c0_12 = arith.constant 0 : index
      %22 = vector.load %arg5[%c0_11, %c0_12] : memref<1x128xf32, #tpu.memory_space<vmem>>, vector<1x128xf32>
      tpu.vector_store %arg5[%c0_11, %c0_12], %21 {strides = array<i32>} : memref<1x128xf32, #tpu.memory_space<vmem>>, vector<1x128xf32>,
    } else {
    }
    %c2_i32_6 = arith.constant 2 : i32
    %12 = arith.cmpi sge, %1, %c2_i32_6 : i32
    %13 = arith.extui %12 : i1 to i32
    %c0_i32_7 = arith.constant 0 : i32
    %14 = arith.cmpi ne, %13, %c0_i32_7 : i32
    scf.if %14 {
      %18 = tpu.iota {dimensions = array<i32: 0>} : vector<128x1xi32>
      %c128_i32 = arith.constant 128 : i32
      %19 = arith.muli %1, %c128_i32 : i32
      %20 = vector.broadcast %19 : i32 to vector<128x1xi32>
      %21 = arith.addi %18, %20 : vector<128x1xi32>
      %c0_9 = arith.constant 0 : index
      %c0_10 = arith.constant 0 : index
      %22 = vector.load %arg5[%c0_9, %c0_10] : memref<1x128xf32, #tpu.memory_space<vmem>>, vector<1x128xf32>
      %c300_i32 = arith.constant 300 : i32
      %23 = vector.broadcast %c300_i32 : i32 to vector<128x1xi32>
      %24 = arith.cmpi slt, %21, %23 : vector<128x1xi32>
      %cst = arith.constant 0.000000e+00 : f32
      %25 = vector.shape_cast %24 : vector<128x1xi1> to vector<128x1xi1>
      %26 = vector.broadcast %25 : vector<128x1xi1> to vector<128x128xi1>
      %27 = vector.broadcast %cst : f32 to vector<128x128xf32>
      %28 = arith.select %26, %8, %27 : vector<128x128xi1>, vector<128x128xf32>
      %cst_11 = arith.constant dense<0.000000e+00> : vector<128xf32>
      %29 = vector.multi_reduction <add>, %28, %cst_11 [0] : vector<128x128xf32> to vector<128xf32>
      %30 = vector.shape_cast %29 : vector<128xf32> to vector<1x128xf32>
      %31 = arith.addf %22, %30 : vector<1x128xf32>
      %c0_12 = arith.constant 0 : index
      %c0_13 = arith.constant 0 : index
      %32 = vector.load %arg5[%c0_12, %c0_13] : memref<1x128xf32, #tpu.memory_space<vmem>>, vector<1x128xf32>
      tpu.vector_store %arg5[%c0_12, %c0_13], %31 {strides = array<i32>} : memref<1x128xf32, #tpu.memory_space<vmem>>, vector<1x128xf32>,
    } else {
    }
    %c1_i32 = arith.constant 1 : i32
    %15 = arith.cmpi eq, %arg1, %c1_i32 : i32
    %16 = arith.extui %15 : i1 to i32
    %c0_i32_8 = arith.constant 0 : i32
    %17 = arith.cmpi ne, %16, %c0_i32_8 : i32
    scf.if %17 {
      %c0_9 = arith.constant 0 : index
      %c0_10 = arith.constant 0 : index
      %18 = vector.load %arg5[%c0_9, %c0_10] : memref<1x128xf32, #tpu.memory_space<vmem>>, vector<1x128xf32>
      %cst = arith.constant dense<0.000000e+00> : vector<1xf32>
      %19 = vector.multi_reduction <add>, %18, %cst [1] : vector<1x128xf32> to vector<1xf32>
      %20 = vector.shape_cast %19 : vector<1xf32> to vector<1x1xf32>
      %c0_11 = arith.constant 0 : index
      %c0_12 = arith.constant 0 : index
      %c0_13 = arith.constant 0 : index
      %21 = vector.load %arg4[%c0_11, %c0_12, %c0_13] : memref<1x1x1xf32, #tpu.memory_space<vmem>>, vector<1x1x1xf32>
      %22 = vector.shape_cast %21 : vector<1x1x1xf32> to vector<1x1xf32>
      %23 = vector.shape_cast %20 : vector<1x1xf32> to vector<1x1x1xf32>
      tpu.vector_store %arg4[%c0_11, %c0_12, %c0_13], %23 {strides = array<i32>} : memref<1x1x1xf32, #tpu.memory_space<vmem>>, vector<1x1x1xf32>,
    } else {
    }
    return
  }
  func.func @transform_0(%arg0: i32, %arg1: i32) -> (i32, i32) {
    %c2_i32 = arith.constant 2 : i32
    %0 = arith.muli %arg0, %c2_i32 : i32
    %1 = arith.addi %0, %arg1 : i32
    %c2_i32_0 = arith.constant 2 : i32
    %2 = arith.minsi %1, %c2_i32_0 : i32
    %c0_i32 = arith.constant 0 : i32
    %c0_i32_1 = arith.constant 0 : i32
    return %2, %c0_i32 : i32, i32
  }
  func.func @transform_1(%arg0: i32, %arg1: i32) -> (i32, i32) {
    %c2_i32 = arith.constant 2 : i32
    %0 = arith.muli %arg0, %c2_i32 : i32
    %1 = arith.addi %0, %arg1 : i32
    %c2_i32_0 = arith.constant 2 : i32
    %2 = arith.minsi %1, %c2_i32_0 : i32
    %c0_i32 = arith.constant 0 : i32
    %c0_i32_1 = arith.constant 0 : i32
    return %2, %c0_i32 : i32, i32
  }
  func.func @transform_2(%arg0: i32, %arg1: i32) -> (i32, i32, i32) {
    %c0_i32 = arith.constant 0 : i32
    %c0_i32_0 = arith.constant 0 : i32
    %c0_i32_1 = arith.constant 0 : i32
    return %arg0, %c0_i32, %c0_i32_0 : i32, i32, i32
  }
}

</mosaic_0001>

<bundles_post_ra>
// kernel: tpu_custom_call.1
= control target key start
LH: loop header
LB: loop body
LE: loop exit
PB: predicated region body
PF: predicated region fallthrough
CT: control target
= control target key end

     0   :  { %7 = vsyncpa [#allocation4], 0  ;;  %s1215_s0 = inlined_call_operand.hbm [shape: f32[300,128], index: 0, kind: input, shape index: {}]   ;;  %s1216_s1 = inlined_call_operand.hbm [shape: f32[300,128], index: 1, kind: input, shape index: {}]   ;;  %s1217_s2 = inlined_call_operand.vmem [shape: f32[2,1,1], index: 2, kind: output, shape index: {}]  }
   0x1   :  { %9 = vsyncpa [#allocation4 + $0x1], 0 }
   0x2   :  { %10 = vsyncpa [#allocation6], 0 }
   0x3   :  { %12 = vsyncpa [#allocation6 + $0x1], 0  ;;  %s882_s9 = smov 0   ;;  %s884_s10 = smov 0  }
   0x4   :  { %s886_s11 = smov 0   ;;  %s888_s12 = smov 0  }
   0x5   :  { %s890_s13 = smov 0   ;;  %s892_s14 = smov 0  }
   0x6   :  { %s894_s15 = smov 0   ;;  %s896_s16 = smov 0  }
   0x7 LB: > { %s27_s17 = sadd.s32 1, %s850_s14  ;;  %s30_s18 = sadd.s32 1, %s854_s15  ;;  %s858_s16 = sphi %s896_s16, %s18_s16   ;;  %s854_s15 = sphi %s894_s15, %s1228_s15   ;;  %s850_s14 = sphi %s892_s14, %s1227_s14   ;;  %s846_s13 = sphi %s890_s13, %s1226_s13   ;;  %s842_s12 = sphi %s888_s12, %s1225_s12   ;;  %s838_s11 = sphi %s886_s11, %s1224_s11   ;;  %s834_s10 = sphi %s884_s10, %s1223_s10   ;;  %s830_s9 = sphi %s882_s9, %s1222_s9  }
   0x8   : > { %p28_p0 = scmp.ge.s32.totalorder %s27_s17, 2  ;;  %s602_s19 = sadd.s32 4294967295, %s858_s16  }
   0x9   : > { %s604_s20 = sshll.u32 %s854_s15, 1  ;;  %p52_p1 = scmp.ne.s32.totalorder %s838_s11, %s834_s10 }
   0xa   : > { %s1230_s17 = smov (%p28_p0, %s27_s17), 0  ;;  %s1232_s18 = smov (!%p28_p0, %s30_s18), %s854_s15 }
   0xb   : > { %s35_s21 = sadd.s32 %s850_s14, %s604_s20  ;;  %p32_p2 = scmp.ge.s32.totalorder %s1232_s18, 2 }
   0xc   : > { %p36_p3 = scmp.lt.s32.totalorder %s35_s21, 2  ;;  %p53_p4 = scmp.eq.s32.totalorder %s858_s16, 0 }
   0xd   : > { %p58_p5 = scmp.ne.s32.totalorder %s834_s10, %s830_s9  ;;  %s1234_s18 = smov (%p32_p2, %s1232_s18), 0 }
   0xe   : > { %s1236_s21 = smov (!%p36_p3, %s35_s21), 2  ;;  %s605_s22 = sshll.u32 %s1234_s18, 1 }
   0xf   : > { %p937_p6 = por %p53_p4, %p52_p1  ;;  %s39_s24 = sadd.s32 %s605_s22, %s1230_s17 }
  0x10   : > { %p59_p7 = scmp.eq.s32.totalorder %s602_s19, 0  ;;  %p40_p8 = scmp.lt.s32.totalorder %s39_s24, 2 }
  0x11   : > { %s45_s27 = sadd.s32 1, %s838_s11  ;;  %p609_p11 = scmp.ge.s32.totalorder %s858_s16, 4 }
  0x12   : > { %p942_p9 = por %p59_p7, %p58_p5  ;;  %s1238_s24 = smov (!%p40_p8, %s39_s24), 2 }
  0x13   : > { %s42_s26 = ssub.s32 %s1236_s21, %s1238_s24  ;;  %138 = sbr.rel (%p609_p11) target bundleno = 96 (0x60), region = 16 }
  0x14   : > { %p43_p10 = scmp.eq.s32.totalorder %s42_s26, 0 }
  0x16   : > { %s949_s28 = scalar_select %p43_p10, %s838_s11, %s45_s27  }
  0x18   : > { %141 = sbr.rel (!%p937_p6) target bundleno = 60 (0x3c), region = 20  ;;  %s142_s29 = sand.u32 (%p937_p6), 1, %s838_s11  }
  0x19   : > { %s612_s30 = sshll.u32 (%p937_p6), %s1236_s21, 4  ;;  %s610_s3 = sshll.u32 (%p937_p6), %s142_s29, 7 }
  0x1a   : > { %s152_s4 = ssub.s32 (%p937_p6), 38, %s612_s30  ;;  %s959_s8 = scalar_lea.sflag (%p937_p6), [#allocation4], %s142_s29 }
  0x1b   : > { %p153_p12 = scmp.lt.s32.totalorder (%p937_p6), %s152_s4, 16  ;;  %s146_s9 = scalar_lea.vmem (%p937_p6), [#allocation3], %s610_s3 }
  0x1d   : > { %s1240_s4 = smov (!%p153_p12, %s152_s4), 16 }
  0x1e   : > { %s613_s5 = sshll.u32 %s1240_s4, 3 }
  0x1f   : > { %s156_s6 = ssub.s32 128, %s613_s5 }
  0x20   : > { %s157_s7 = sshll.u32 %s156_s6, 4 }
  0x21   : > { %158 = vsyncadd %s959_s8, %s157_s7  ;;  %p962_p13 = scmp.ne.s32.totalorder %s613_s5, 0  ;;  %s637_s20 = sshll.u32 %s1236_s21, 7 }
  0x22   : > { %s161_s26 = scalar_lea.hbm %s1215_s0, %s637_s20  ;;  %s970_s27 = sshll.u32 %s146_s9, 4  ;;  %s166_s27 = int_to_ptr.vmem [resolvable:$true] %s970_s27 }
  0x23   : > { %s163_s29 = sshll.u32 %s161_s26, 4  ;;  %s617_s30 = sshll.u32 %s1240_s4, 7  ;;  %s973_s29 = int_to_ptr.hbm [resolvable:$true] %s163_s29 }
  0x24   : > { %s710_s3 = sshra.s32 %s973_s29, 4  ;;  %s712_s5 = sshrl.u32 %s617_s30, 4  ;;  %s711_s3 = int_to_ptr.hbm [resolvable:$true] %s710_s3 }
  0x25   : > { %s717_s6 = scalar_lea.hbm %s711_s3, %s712_s5  ;;  %s721_s9 = scalar_lea.hbm %s1215_s0, 304 }
  0x26   : > { %p718_p0 = scmp.ne.s32.totalorder %s711_s3, %s717_s6  ;;  %p723_p3 = scmp.lt.s32.totalorder %s721_s9, %s717_s6 }
  0x28   : > { %p719_p1 = pnand %p718_p0, %p962_p13 }
  0x2a   : > { %p720_p2 = pneg %p719_p1 }
  0x2c   : > { %p725_p4 = pnand %p723_p3, %p720_p2 }
  0x2e   : > { %728 = shalt.err (!%p725_p4)
}
  0x2f   : > { %s729_s22 = sshra.s32 %s166_s27, 4  ;;  %s860_s26 = smov [#allocation3]   ;;  %s730_s22 = int_to_ptr.vmem [resolvable:$true] %s729_s22 }
  0x30   : > { %s736_s24 = scalar_lea.vmem %s730_s22, %s712_s5  ;;  %s740_s3 = scalar_lea.vmem %s860_s26, 256 }
  0x31   : > { %p737_p5 = scmp.ne.s32.totalorder %s730_s22, %s736_s24  ;;  %p742_p10 = scmp.lt.s32.totalorder %s740_s3, %s736_s24 }
  0x33   : > { %p738_p7 = pnand %p737_p5, %p962_p13 }
  0x35   : > { %p739_p8 = pneg %p738_p7 }
  0x37   : > { %p744_p11 = pnand %p742_p10, %p739_p8 }
  0x39   : > { %747 = shalt.err (!%p744_p11)
}
  0x3a   : > { %s861_s7 = smov 128   ;;  %s862_s6 = smov 8  }
  0x3b   : > { %171 = dma.hbm_to_vmem [thread:$0]  (%p962_p13), %s973_s29, %s617_s30, %s166_s27, %s959_s8, %s861_s7, %s861_s7, %s862_s6  }
  0x3c PF: > { %174 = sbr.rel (!%p937_p6) target bundleno = 96 (0x60), region = 24  ;;  %s175_s5 = sand.u32 (%p937_p6), 1, %s838_s11  }
  0x3d   : > { %s620_s20 = sshll.u32 (%p937_p6), %s1236_s21, 4  ;;  %s618_s9 = sshll.u32 (%p937_p6), %s175_s5, 7 }
  0x3e   : > { %s185_s22 = ssub.s32 (%p937_p6), 38, %s620_s20  ;;  %s1003_s3 = scalar_lea.sflag (%p937_p6), [#allocation6], %s175_s5 }
  0x3f   : > { %p186_p12 = scmp.lt.s32.totalorder (%p937_p6), %s185_s22, 16  ;;  %s179_s4 = scalar_lea.vmem (%p937_p6), [#allocation5], %s618_s9 }
  0x41   : > { %s1242_s22 = smov (!%p186_p12, %s185_s22), 16 }
  0x42   : > { %s621_s24 = sshll.u32 %s1242_s22, 3 }
  0x43   : > { %s189_s26 = ssub.s32 128, %s621_s24 }
  0x44   : > { %s190_s19 = sshll.u32 %s189_s26, 4 }
  0x45   : > { %191 = vsyncadd %s1003_s3, %s190_s19  ;;  %p1006_p6 = scmp.ne.s32.totalorder %s621_s24, 0  ;;  %s638_s8 = sshll.u32 %s1236_s21, 7 }
  0x46   : > { %s194_s30 = scalar_lea.hbm %s1216_s1, %s638_s8  ;;  %s1014_s7 = sshll.u32 %s179_s4, 4  ;;  %s199_s7 = int_to_ptr.vmem [resolvable:$true] %s1014_s7 }
  0x47   : > { %s196_s6 = sshll.u32 %s194_s30, 4  ;;  %s625_s5 = sshll.u32 %s1242_s22, 7  ;;  %s1017_s6 = int_to_ptr.hbm [resolvable:$true] %s196_s6 }
  0x48   : > { %s749_s20 = sshra.s32 %s1017_s6, 4  ;;  %s751_s9 = sshrl.u32 %s625_s5, 4  ;;  %s750_s20 = int_to_ptr.hbm [resolvable:$true] %s749_s20 }
  0x49   : > { %s756_s24 = scalar_lea.hbm %s750_s20, %s751_s9  ;;  %s760_s19 = scalar_lea.hbm %s1216_s1, 304 }
  0x4a   : > { %p757_p13 = scmp.ne.s32.totalorder %s750_s20, %s756_s24  ;;  %p762_p2 = scmp.lt.s32.totalorder %s760_s19, %s756_s24 }
  0x4c   : > { %p758_p0 = pnand %p757_p13, %p1006_p6 }
  0x4e   : > { %p759_p1 = pneg %p758_p0 }
  0x50   : > { %p764_p3 = pnand %p762_p2, %p759_p1 }
  0x52   : > { %767 = shalt.err (!%p764_p3)
}
  0x53   : > { %s768_s4 = sshra.s32 %s199_s7, 4  ;;  %s863_s27 = smov [#allocation5]   ;;  %s769_s4 = int_to_ptr.vmem [resolvable:$true] %s768_s4 }
  0x54   : > { %s775_s8 = scalar_lea.vmem %s769_s4, %s751_s9  ;;  %s779_s29 = scalar_lea.vmem %s863_s27, 256 }
  0x55   : > { %p776_p4 = scmp.ne.s32.totalorder %s769_s4, %s775_s8  ;;  %p781_p8 = scmp.lt.s32.totalorder %s779_s29, %s775_s8 }
  0x57   : > { %p777_p5 = pnand %p776_p4, %p1006_p6 }
  0x59   : > { %p778_p7 = pneg %p777_p5 }
  0x5b   : > { %p783_p10 = pnand %p781_p8, %p778_p7 }
  0x5d   : > { %786 = shalt.err (!%p783_p10)
}
  0x5e   : > { %s864_s30 = smov 128   ;;  %s865_s20 = smov 8  }
  0x5f   : > { %204 = dma.hbm_to_vmem [thread:$0]  (%p1006_p6), %s1017_s6, %s625_s5, %s199_s7, %s1003_s3, %s864_s30, %s864_s30, %s865_s20  }
  0x60 PF: > { %p626_p11 = scmp.ge.s32.totalorder %s858_s16, 1  ;;  %p206_p12 = scmp.lt.s32.totalorder %s858_s16, 5 }
  0x62   : > { %p207_p13 = pnand %p626_p11, %p206_p12 }
  0x63   : > { %s212_s9 = sand.u32 (!%p207_p13), 1, %s834_s10  }
  0x64   : > { %210 = sbr.rel (%p207_p13) target bundleno = 366 (0x16e), region = 28  ;;  %s627_s24 = sshll.u32 (!%p207_p13), %s212_s9, 7 }
  0x65   : > { %s213_s21 = scalar_lea.sflag (!%p207_p13), [#allocation4], %s212_s9  ;;  %s1043_s26 = scalar_lea.vmem (!%p207_p13), [#allocation3], %s627_s24 }
  0x69   : > { %821 = dma.done.wait (%p942_p9), %s213_s21, 2048  }
  0x6a   : > { %823 = vsyncadd (%p942_p9), %s213_s21, 4294965248  ;;  %s223_s22 = scalar_lea.sflag [#allocation6], %s212_s9  ;;  %s1049_s3 = scalar_lea.vmem [#allocation5], %s627_s24 }
  0x6b   : > { %825 = dma.done.wait (%p942_p9), %s223_s22, 2048  }
  0x6c   : > { %827 = vsyncadd (%p942_p9), %s223_s22, 4294965248  ;;  %p269_p6 = scmp.lt.s32.totalorder %s846_s13, 1  ;;  %s629_s23 = sshll.u32 %s846_s13, 1 }
  0x6d   : > { %s1058_s7 = sadd.s32 %s842_s12, %s629_s23  ;;  %p630_p0 = scmp.ne.s32.totalorder %s842_s12, 0 }
  0x6e   : > { %s1244_s13 = smov (!%p269_p6, %s846_s13), 1 }
  0x6f   : > { %s271_s19 = scalar_lea.vmem %s1217_s2, %s1244_s13  ;;  %277 = sbr.rel (%p630_p0) target bundleno = 118 (0x76), region = 40 }
  0x74   : > { %v866_v0 = vmov 0.0  }
  0x75   : > { %278 = vst [vmem:[#allocation2] sm:$0x1] %v866_v0 }
  0x76 PF: > { %v279_v1 = vld [vmem:[%s1043_s26] sm:$0xff]  ;;  %v280_v2 = vld [vmem:[%s1043_s26 + $0x8] sm:$0xff]  ;;  %v281_v3 = vld [vmem:[%s1043_s26 + $0x10] sm:$0xff]  ;;  %p631_p9 = scmp.ge.s32.totalorder %s1058_s7, 2 }
  0x77   : > { %v282_v4 = vld [vmem:[%s1043_s26 + $0x18] sm:$0xff]  ;;  %v283_v5 = vld [vmem:[%s1043_s26 + $0x20] sm:$0xff]  ;;  %v284_v6 = vld [vmem:[%s1043_s26 + $0x28] sm:$0xff] }
  0x78   : > { %v285_v7 = vld [vmem:[%s1043_s26 + $0x30] sm:$0xff]  ;;  %v286_v8 = vld [vmem:[%s1043_s26 + $0x38] sm:$0xff]  ;;  %v287_v9 = vld [vmem:[%s1043_s26 + $0x40] sm:$0xff] }
  0x79   : > { %v288_v10 = vld [vmem:[%s1043_s26 + $0x48] sm:$0xff]  ;;  %v289_v11 = vld [vmem:[%s1043_s26 + $0x50] sm:$0xff]  ;;  %v290_v12 = vld [vmem:[%s1043_s26 + $0x58] sm:$0xff] }
  0x7a   : > { %v291_v13 = vld [vmem:[%s1043_s26 + $0x60] sm:$0xff]  ;;  %v292_v14 = vld [vmem:[%s1043_s26 + $0x68] sm:$0xff]  ;;  %v293_v17 = vld [vmem:[%s1043_s26 + $0x70] sm:$0xff] }
  0x7b   : > { %v295_v15 = vld [vmem:[%s1049_s3] sm:$0xff]  ;;  %v296_v16 = vld [vmem:[%s1049_s3 + $0x8] sm:$0xff]  ;;  %v294_v18 = vld [vmem:[%s1043_s26 + $0x78] sm:$0xff] }
  0x7c   : > { %v297_v19 = vld [vmem:[%s1049_s3 + $0x10] sm:$0xff]  ;;  %v298_v20 = vld [vmem:[%s1049_s3 + $0x18] sm:$0xff]  ;;  %v299_v21 = vld [vmem:[%s1049_s3 + $0x20] sm:$0xff]  ;;  %v311_v22 = vsub.f32 %v279_v1, %v295_v15  ;;  %v312_v23 = vsub.f32 %v280_v2, %v296_v16 }
  0x7d   : > { %v300_v24 = vld [vmem:[%s1049_s3 + $0x28] sm:$0xff]  ;;  %v301_v25 = vld [vmem:[%s1049_s3 + $0x30] sm:$0xff]  ;;  %v302_v26 = vld [vmem:[%s1049_s3 + $0x38] sm:$0xff]  ;;  %v313_v27 = vsub.f32 %v281_v3, %v297_v19  ;;  %v314_v28 = vsub.f32 %v282_v4, %v298_v20  ;;  %v315_v29 = vsub.f32 %v283_v5, %v299_v21 }
  0x7e   : > { %v303_v30 = vld [vmem:[%s1049_s3 + $0x40] sm:$0xff]  ;;  %v304_v31 = vld [vmem:[%s1049_s3 + $0x48] sm:$0xff]  ;;  %v305_v32 = vld [vmem:[%s1049_s3 + $0x50] sm:$0xff]  ;;  %v316_v33 = vsub.f32 %v284_v6, %v300_v24  ;;  %v317_v34 = vsub.f32 %v285_v7, %v301_v25  ;;  %v318_v35 = vsub.f32 %v286_v8, %v302_v26  ;;  %v1095_v36 = vmul.f32 %v311_v22, %v311_v22 }
  0x7f   : > { %v306_v37 = vld [vmem:[%s1049_s3 + $0x58] sm:$0xff]  ;;  %v307_v38 = vld [vmem:[%s1049_s3 + $0x60] sm:$0xff]  ;;  %v308_v39 = vld [vmem:[%s1049_s3 + $0x68] sm:$0xff]  ;;  %v319_v40 = vsub.f32 %v287_v9, %v303_v30  ;;  %v320_v41 = vsub.f32 %v288_v10, %v304_v31  ;;  %v321_v42 = vsub.f32 %v289_v11, %v305_v32  ;;  %v1100_v43 = vmul.f32 %v312_v23, %v312_v23 }
  0x80   : > { %v309_v44 = vld [vmem:[%s1049_s3 + $0x70] sm:$0xff]  ;;  %v310_v45 = vld [vmem:[%s1049_s3 + $0x78] sm:$0xff]  ;;  %v322_v46 = vsub.f32 %v290_v12, %v306_v37  ;;  %v323_v47 = vsub.f32 %v291_v13, %v307_v38  ;;  %v324_v48 = vsub.f32 %v292_v14, %v308_v39  ;;  %v1104_v49 = vmul.f32 %v313_v27, %v313_v27  ;;  %346 = sbr.rel (%p631_p9) target bundleno = 178 (0xb2), region = 44 }
  0x81   : > { %v325_v50 = vsub.f32 %v293_v17, %v309_v44  ;;  %v326_v51 = vsub.f32 %v294_v18, %v310_v45  ;;  %v1106_v52 = vmul.f32 %v314_v28, %v314_v28  ;;  %v1108_v53 = vmul.f32 %v315_v29, %v315_v29 }
  0x82   : > { %v1110_v54 = vmul.f32 %v316_v33, %v316_v33  ;;  %v1112_v55 = vmul.f32 %v317_v34, %v317_v34  ;;  %v1114_v56 = vmul.f32 %v318_v35, %v318_v35  ;;  %v1116_v57 = vmul.f32 %v319_v40, %v319_v40 }
  0x83   : > { %v1118_v58 = vmul.f32 %v320_v41, %v320_v41  ;;  %v1120_v59 = vmul.f32 %v321_v42, %v321_v42  ;;  %v1122_v60 = vmul.f32 %v322_v46, %v322_v46  ;;  %v1124_v61 = vmul.f32 %v323_v47, %v323_v47 }
  0x84   : > { %v1126_v62 = vmul.f32 %v324_v48, %v324_v48  ;;  %v1128_v63 = vmul.f32 %v325_v50, %v325_v50  ;;  %v1130_v0 = vmul.f32 %v326_v51, %v326_v51 }
  0x85   : > { %v348_v1 = vadd.f32 %v1100_v43, %v1095_v36  ;;  %v347_v21 = vld [vmem:[#allocation2] sm:$0x1] }
  0x87   : > { %v349_v2 = vadd.f32 %v348_v1, %v1104_v49 }
  0x89   : > { %v350_v3 = vadd.f32 %v349_v2, %v1106_v52 }
  0x8b   : > { %v351_v4 = vadd.f32 %v350_v3, %v1108_v53 }
  0x8d   : > { %v352_v5 = vadd.f32 %v351_v4, %v1110_v54 }
  0x8f   : > { %v353_v6 = vadd.f32 %v352_v5, %v1112_v55 }
  0x91   : > { %v354_v7 = vadd.f32 %v353_v6, %v1114_v56 }
  0x93   : > { %v355_v8 = vadd.f32 %v354_v7, %v1116_v57 }
  0x95   : > { %v356_v9 = vadd.f32 %v355_v8, %v1118_v58 }
  0x97   : > { %v357_v10 = vadd.f32 %v356_v9, %v1120_v59 }
  0x99   : > { %v358_v11 = vadd.f32 %v357_v10, %v1122_v60 }
  0x9b   : > { %v359_v12 = vadd.f32 %v358_v11, %v1124_v61 }
  0x9d   : > { %v360_v13 = vadd.f32 %v359_v12, %v1126_v62 }
  0x9f   : > { %v361_v14 = vadd.f32 %v360_v13, %v1128_v63 }
  0xa1   : > { %v362_v15 = vadd.f32 %v361_v14, %v1130_v0 }
  0xa3   : > { %v363_v16 = vrot.slane %v362_v15, 4 }
  0xa5   : > { %v364_v17 = vadd.f32 %v363_v16, %v362_v15 }
  0xa7   : > { %v365_v18 = vrot.slane %v364_v17, 2 }
  0xa9   : > { %v366_v19 = vadd.f32 %v365_v18, %v364_v17 }
  0xab   : > { %v367_v20 = vrot.slane %v366_v19, 1 }
  0xad   : > { %v368_v22 = vadd.f32 %v367_v20, %v366_v19 }
  0xaf   : > { %v369_v23 = vadd.f32 %v368_v22, %v347_v21 }
  0xb1   : > { %370 = vst [vmem:[#allocation2] sm:$0x1] %v369_v23 }
  0xb2 PF: > { %p632_p1 = scmp.lt.s32.totalorder %s1058_s7, 2 }
  0xb3   : > { %s633_s25 = sshll.u32 (!%p632_p1), %s1058_s7, 7 }
  0xb4   : > { %374 = sbr.rel (%p632_p1) target bundleno = 240 (0xf0), region = 48 }
  0xb9   : > { %v375_v24 = vlaneseq  ;;  %v1151_v27 = vstv %s633_s25 }
  0xbb   : > { %v376_v25 = vshrl.u32 %v375_v24, 7 }
  0xbd   : > { %v377_v26 = vadd.s32 8, %v376_v25  ;;  %v378_v28 = vadd.s32 16, %v376_v25  ;;  %v379_v29 = vadd.s32 24, %v376_v25  ;;  %v394_v30 = vadd.s32 %v1151_v27, %v376_v25 }
  0xbe   : > { %v380_v32 = vadd.s32 32, %v376_v25  ;;  %v381_v34 = vadd.s32 40, %v376_v25  ;;  %v382_v37 = vadd.s32 48, %v376_v25  ;;  %v383_v41 = vadd.s32 56, %v376_v25 }
  0xbf   : > { %v395_v31 = vadd.s32 %v1151_v27, %v377_v26  ;;  %v396_v33 = vadd.s32 %v1151_v27, %v378_v28  ;;  %v397_v35 = vadd.s32 %v1151_v27, %v379_v29  ;;  %vm411_vm0 = vcmp.lt.s32.totalorder %v394_v30, 300 }
  0xc0   : > { %v398_v38 = vadd.s32 %v1151_v27, %v380_v32  ;;  %v459_v39 = vsel %vm411_vm0, %v1095_v36, 0.0  ;;  %v399_v42 = vadd.s32 %v1151_v27, %v381_v34  ;;  %v384_v45 = vadd.s32 64, %v376_v25  ;;  %v410_v34 = vld [vmem:[#allocation2] sm:$0x1] }
  0xc1   : > { %vm412_vm1 = vcmp.lt.s32.totalorder %v395_v31, 300  ;;  %vm413_vm2 = vcmp.lt.s32.totalorder %v396_v33, 300  ;;  %vm414_vm3 = vcmp.lt.s32.totalorder %v397_v35, 300  ;;  %v400_v46 = vadd.s32 %v1151_v27, %v382_v37 }
  0xc2   : > { %v460_v40 = vsel %vm412_vm1, %v1100_v43, 0.0  ;;  %v461_v44 = vsel %vm413_vm2, %v1104_v49, 0.0  ;;  %vm415_vm4 = vcmp.lt.s32.totalorder %v398_v38, 300  ;;  %v462_v48 = vsel %vm414_vm3, %v1106_v52, 0.0 }
  0xc3   : > { %v475_v47 = vadd.f32 %v460_v40, %v459_v39  ;;  %v385_v50 = vadd.s32 72, %v376_v25  ;;  %v401_v51 = vadd.s32 %v1151_v27, %v383_v41  ;;  %vm416_vm5 = vcmp.lt.s32.totalorder %v399_v42, 300 }
  0xc4   : > { %v463_v43 = vsel %vm415_vm4, %v1108_v53, 0.0  ;;  %v386_v1 = vadd.s32 80, %v376_v25  ;;  %v402_v2 = vadd.s32 %v1151_v27, %v384_v45  ;;  %vm417_vm6 = vcmp.lt.s32.totalorder %v400_v46, 300 }
  0xc5   : > { %v476_v36 = vadd.f32 %v475_v47, %v461_v44  ;;  %v464_v49 = vsel %vm416_vm5, %v1110_v54, 0.0  ;;  %v387_v4 = vadd.s32 88, %v376_v25  ;;  %v403_v5 = vadd.s32 %v1151_v27, %v385_v50 }
  0xc6   : > { %vm418_vm7 = vcmp.lt.s32.totalorder %v401_v51, 300  ;;  %v465_v52 = vsel %vm417_vm6, %v1112_v55, 0.0  ;;  %v388_v7 = vadd.s32 96, %v376_v25  ;;  %v404_v8 = vadd.s32 %v1151_v27, %v386_v1 }
  0xc7   : > { %v477_v3 = vadd.f32 %v476_v36, %v462_v48  ;;  %vm419_vm8 = vcmp.lt.s32.totalorder %v402_v2, 300  ;;  %v466_v53 = vsel %vm418_vm7, %v1114_v56, 0.0  ;;  %v389_v10 = vadd.s32 104, %v376_v25 }
  0xc8   : > { %v405_v11 = vadd.s32 %v1151_v27, %v387_v4  ;;  %vm420_vm9 = vcmp.lt.s32.totalorder %v403_v5, 300  ;;  %v467_v54 = vsel %vm419_vm8, %v1116_v57, 0.0  ;;  %v390_v13 = vadd.s32 112, %v376_v25 }
  0xc9   : > { %v478_v6 = vadd.f32 %v477_v3, %v463_v43  ;;  %v406_v14 = vadd.s32 %v1151_v27, %v388_v7  ;;  %vm421_vm10 = vcmp.lt.s32.totalorder %v404_v8, 300  ;;  %v468_v55 = vsel %vm420_vm9, %v1118_v58, 0.0 }
  0xca   : > { %v391_v16 = vadd.s32 120, %v376_v25  ;;  %v407_v17 = vadd.s32 %v1151_v27, %v389_v10  ;;  %vm422_vm11 = vcmp.lt.s32.totalorder %v405_v11, 300  ;;  %v469_v56 = vsel %vm421_vm10, %v1120_v59, 0.0 }
  0xcb   : > { %v479_v9 = vadd.f32 %v478_v6, %v464_v49  ;;  %v408_v19 = vadd.s32 %v1151_v27, %v390_v13  ;;  %vm423_vm12 = vcmp.lt.s32.totalorder %v406_v14, 300  ;;  %v470_v57 = vsel %vm422_vm11, %v1122_v60, 0.0 }
  0xcc   : > { %v409_v21 = vadd.s32 %v1151_v27, %v391_v16  ;;  %vm424_vm13 = vcmp.lt.s32.totalorder %v407_v17, 300  ;;  %v471_v23 = vsel %vm423_vm12, %v1124_v61, 0.0 }
  0xcd   : > { %v480_v12 = vadd.f32 %v479_v9, %v465_v52  ;;  %vm425_vm14 = vcmp.lt.s32.totalorder %v408_v19, 300  ;;  %v472_v24 = vsel %vm424_vm13, %v1126_v62, 0.0 }
  0xce   : > { %vm426_vm15 = vcmp.lt.s32.totalorder %v409_v21, 300  ;;  %v473_v59 = vsel %vm425_vm14, %v1128_v63, 0.0 }
  0xcf   : > { %v481_v15 = vadd.f32 %v480_v12, %v466_v53  ;;  %v474_v28 = vsel %vm426_vm15, %v1130_v0, 0.0 }
  0xd1   : > { %v482_v18 = vadd.f32 %v481_v15, %v467_v54 }
  0xd3   : > { %v483_v20 = vadd.f32 %v482_v18, %v468_v55 }
  0xd5   : > { %v484_v22 = vadd.f32 %v483_v20, %v469_v56 }
  0xd7   : > { %v485_v58 = vadd.f32 %v484_v22, %v470_v57 }
  0xd9   : > { %v486_v25 = vadd.f32 %v485_v58, %v471_v23 }
  0xdb   : > { %v487_v26 = vadd.f32 %v486_v25, %v472_v24 }
  0xdd   : > { %v488_v29 = vadd.f32 %v487_v26, %v473_v59 }
  0xdf   : > { %v489_v30 = vadd.f32 %v488_v29, %v474_v28 }
  0xe1   : > { %v490_v60 = vrot.slane %v489_v30, 4 }
  0xe3   : > { %v491_v31 = vadd.f32 %v490_v60, %v489_v30 }
  0xe5   : > { %v492_v27 = vrot.slane %v491_v31, 2 }
  0xe7   : > { %v493_v32 = vadd.f32 %v492_v27, %v491_v31 }
  0xe9   : > { %v494_v33 = vrot.slane %v493_v32, 1 }
  0xeb   : > { %v495_v61 = vadd.f32 %v494_v33, %v493_v32 }
  0xed   : > { %v496_v35 = vadd.f32 %v495_v61, %v410_v34 }
  0xef   : > { %497 = vst [vmem:[#allocation2] sm:$0x1] %v496_v35 }
  0xf0 PF: > { %p634_p2 = scmp.ne.s32.totalorder %s842_s12, 1 }
  0xf2   : > { %501 = sbr.rel (%p634_p2) target bundleno = 366 (0x16e), region = 52 }
  0xf7   : > { %v502_v62 = vld [vmem:[#allocation2] sm:$0x1]  ;;  %vm503_vm0 = vcmask 1040384   ;;  %vm507_vm1 = vcmask 0  }
  0xf8   : > { %v504_v63 = vsel %vm503_vm0, %v502_v62, 0.0 }
  0xf9   : > { %505 = vadd.xlane.f32.xlu0 %v504_v63 }
 0x16c   : > { %v506_v0 = vpop.xlane.xlu0 %505 }
 0x16d   : > { %508 = vst.msk [vmem:[%s271_s19] sm:$0x1] %vm507_vm1, %v506_v0 }
 0x16e PF: > { %s18_s16 = sadd.s32 1, %s858_s16   ;;  %s1222_s9 = smov %s834_s10 }
 0x16f   : > { %p15_p3 = scmp.ge.s32.totalorder %s18_s16, 6   ;;  %s1223_s10 = smov %s838_s11 }
 0x170   : > { %s1224_s11 = smov %s949_s28  ;;  %s1225_s12 = smov %s850_s14 }
 0x171   : > { %s1226_s13 = smov %s854_s15  ;;  %s1227_s14 = smov %s1230_s17 }
 0x172   : > { %s1228_s15 = smov %s1234_s18  ;;  %17 = sbr.rel (!%p15_p3) target bundleno = 7 (0x7), region = 97 }
 0x177   :  { %526 = vsyncpa [#allocation4], 1 }
 0x178   :  { %528 = vsyncpa [#allocation4 + $0x1], 1 }
 0x179   :  { %529 = vsyncpa [#allocation6], 1 }
 0x17a   :  { %531 = vsyncpa [#allocation6 + $0x1], 1 }

</bundles_post_ra>
